<compile_context>
chip_gen: v7x
topology: tpu7x:2x2x1
jax: 0.10.0
libtpu: 0.0.40
codegen_flags: <defaults>
</compile_context>

<pallas_src>
import math
import functools

import jax
import jax.numpy as jnp
from jax.experimental import pallas as pl
from jax.experimental.pallas import tpu as pltpu


def _attn_kernel(q_ref, k_ref, v_ref, mask_ref, resid_ref, wfc_ref, out_ref,
                 *, eps, compute_dtype):
    f32 = jnp.float32
    cd = compute_dtype

    Bb, H, Tq, dk = q_ref.shape
    S = k_ref.shape[2]
    D = wfc_ref.shape[0]
    rows = Bb * Tq

    # ---- scores: batched over (batch block, head); compute_dtype inputs on
    #      the MXU with f32 accumulation.  Leading-dim reshapes are free.
    q = q_ref[...].reshape(Bb * H, Tq, dk)          # 1/sqrt(d_k) folded in wrapper
    k = k_ref[...].reshape(Bb * H, S, dk)
    scores = jnp.einsum('bqd,bkd->bqk', q, k,
                        preferred_element_type=f32).reshape(Bb, H, Tq, S)

    # ---- masked_fill(attn_mask, -1e9), mask broadcast over heads.
    maskf = mask_ref[...].astype(f32)[:, None, :, :]          # (Bb, 1, Tq, S)
    scores = jnp.where(maskf != 0.0, f32(-1e9), scores)

    # ---- numerically stable softmax; normalization deferred past PV matmul.
    m = jnp.max(scores, axis=-1, keepdims=True)
    p = jnp.exp((scores - m).astype(cd))            # bf16 exp on the bf16 path
    l = jnp.sum(p.astype(f32), axis=-1, keepdims=True)        # (Bb, H, Tq, 1)

    v = v_ref[...].reshape(Bb * H, S, dk)
    ctx = jnp.einsum('bqk,bkd->bqd', p.reshape(Bb * H, Tq, S), v,
                     preferred_element_type=f32).reshape(Bb, H, Tq, dk)
    ctx = ctx * pl.reciprocal(l)                    # exact (f32 path @ 1e-4)

    # ---- merge heads (static lane concat) -> single full-D fc matmul.
    merged = jnp.concatenate([ctx[:, h] for h in range(H)], axis=-1)  # (Bb,Tq,D)
    merged = merged.reshape(rows, D).astype(cd)
    y = jnp.dot(merged, wfc_ref[...], preferred_element_type=f32)     # (rows, D)

    # ---- residual + LayerNorm(d_model): fresh nn.LayerNorm -> w=1, b=0, eps=1e-5.
    y = y + resid_ref[...].reshape(rows, D).astype(f32)
    mean = jnp.mean(y, axis=-1, keepdims=True)
    var = jnp.mean(jnp.square(y - mean), axis=-1, keepdims=True)
    out = (y - mean) * jax.lax.rsqrt(var + eps)
    out_ref[...] = out.reshape(Bb, Tq, D).astype(out_ref.dtype)


def multi_head_attention(Q, K, V, attn_mask, Wq, Wk, Wv, Wfc, n_heads, *,
                         block_b=1, block_q=None,
                         compute_dtype=jnp.float32):
    """Q, K, V: (B, S, D); attn_mask: (B, S, S), nonzero/True == masked.
    Wq/Wk/Wv/Wfc: nn.Linear weights of shape (D, D) (y = x @ W.T, bias=False)."""
    B, S, D = Q.shape
    assert D % n_heads == 0
    d_k = D // n_heads

    if block_q is None:                 # parallel (b, q) grid, MXU-filling rows
        block_q = S if (S <= 128 or S % 128 != 0) else 128
    assert B % block_b == 0
    assert S % block_q == 0 and (block_q == S or block_q % 8 == 0)

    hi = jax.lax.Precision.HIGHEST
    scale = 1.0 / math.sqrt(d_k)

    def project(x, W):
        # nn.Linear(bias=False): x @ W.T, then split heads -> (B, H, S, d_k).
        y = jnp.einsum('bsd,od->bso', x, W, precision=hi)
        return y.reshape(B, S, n_heads, d_k).transpose(0, 2, 1, 3)

    # One lane-dense GEMM per projection (done once, not per query block/head);
    # ship to the kernel in compute_dtype to halve DMA bytes on the bf16 path.
    q_s = (project(Q, Wq) * scale).astype(compute_dtype)   # fold 1/sqrt(d_k)
    k_s = project(K, Wk).astype(compute_dtype)
    v_s = project(V, Wv).astype(compute_dtype)
    wfc_t = Wfc.T.astype(compute_dtype)                    # (D, D): y = ctx @ Wfc.T
    mask_i8 = (attn_mask != 0).astype(jnp.int8)            # compact mask

    # Explicit VMEM budget (v5e scoped default is 16 MiB; v7x physical 64 MiB).
    cd_b = jnp.dtype(compute_dtype).itemsize
    io_b = jnp.dtype(Q.dtype).itemsize
    est = (2 * block_b * n_heads * block_q * d_k * cd_b          # q   (x2 buffers)
           + 2 * 2 * block_b * n_heads * S * d_k * cd_b          # k, v
           + 2 * block_b * block_q * S                           # int8 mask
           + 2 * block_b * block_q * D * io_b                    # residual
           + 2 * block_b * block_q * D * io_b                    # output
           + 2 * D * D * cd_b                                    # fc weight
           + block_b * n_heads * block_q * S * (4 + cd_b)        # scores + p
           + 4 * block_b * block_q * D * 4)                      # f32 temps
    vmem_limit = int(min(max(32 * 1024 * 1024, 2 * est), 64 * 1024 * 1024))

    kernel = functools.partial(_attn_kernel, eps=1e-5, compute_dtype=compute_dtype)
    grid = (B // block_b, S // block_q)

    return pl.pallas_call(
        kernel,
        out_shape=jax.ShapeDtypeStruct((B, S, D), Q.dtype),
        grid=grid,
        in_specs=[
            pl.BlockSpec((block_b, n_heads, block_q, d_k), lambda b, q: (b, 0, q, 0)),
            pl.BlockSpec((block_b, n_heads, S, d_k),       lambda b, q: (b, 0, 0, 0)),
            pl.BlockSpec((block_b, n_heads, S, d_k),       lambda b, q: (b, 0, 0, 0)),
            pl.BlockSpec((block_b, block_q, S),            lambda b, q: (b, q, 0)),
            pl.BlockSpec((block_b, block_q, D),            lambda b, q: (b, q, 0)),
            pl.BlockSpec((D, D),                           lambda b, q: (0, 0)),
        ],
        out_specs=pl.BlockSpec((block_b, block_q, D), lambda b, q: (b, q, 0)),
        compiler_params=pltpu.CompilerParams(
            dimension_semantics=("parallel", "parallel"),
            vmem_limit_bytes=vmem_limit),
    )(q_s, k_s, v_s, mask_i8, Q, wfc_t)


def _reference(Q, K, V, attn_mask, Wq, Wk, Wv, Wfc, n_heads):
    """Pure-JAX reference matching the PyTorch module."""
    B, S, D = Q.shape
    d_k = D // n_heads
    hi = jax.lax.Precision.HIGHEST

    def proj(x, W):  # nn.Linear, bias=False: x @ W.T
        y = jnp.einsum('bsd,od->bso', x, W, precision=hi)
        return y.reshape(B, S, n_heads, d_k).transpose(0, 2, 1, 3)

    q_s, k_s, v_s = proj(Q, Wq), proj(K, Wk), proj(V, Wv)
    scores = jnp.einsum("bhqd,bhkd->bhqk", q_s, k_s, precision=hi) / math.sqrt(d_k)
    scores = jnp.where(attn_mask[:, None, :, :] != 0, -1e9, scores)
    attn = jax.nn.softmax(scores, axis=-1)
    ctx = jnp.einsum("bhqk,bhkd->bhqd", attn, v_s, precision=hi)
    ctx = ctx.transpose(0, 2, 1, 3).reshape(B, S, D)
    out = jnp.einsum('bsd,od->bso', ctx, Wfc, precision=hi) + Q
    mean = out.mean(-1, keepdims=True)
    var = ((out - mean) ** 2).mean(-1, keepdims=True)
    return (out - mean) / jnp.sqrt(var + 1e-5)


if __name__ == "__main__":
    B, S, D, H = 2, 8, 32, 4   # batch, seq, d_model, heads

    key = jax.random.PRNGKey(0)
    kq, kk, kv, kwq, kwk, kwv, kwf = jax.random.split(key, 7)

    Q = jax.random.normal(kq, (B, S, D), dtype=jnp.float32)
    K = jax.random.normal(kk, (B, S, D), dtype=jnp.float32)
    V = jax.random.normal(kv, (B, S, D), dtype=jnp.float32)

    # deterministic weight init (nn.Linear weights have shape [out, in])
    scale = 1.0 / math.sqrt(D)
    Wq = jax.random.uniform(kwq, (D, D), jnp.float32, -scale, scale)
    Wk = jax.random.uniform(kwk, (D, D), jnp.float32, -scale, scale)
    Wv = jax.random.uniform(kwv, (D, D), jnp.float32, -scale, scale)
    Wfc = jax.random.uniform(kwf, (D, D), jnp.float32, -scale, scale)

    # key-padding attention mask (True == masked), like trajbert's pad mask;
    # guarantees no fully-masked query rows.
    lengths = jnp.array([5, 8], dtype=jnp.int32)
    attn_mask = jnp.broadcast_to(
        jnp.arange(S)[None, None, :] >= lengths[:, None, None], (B, S, S))

    ref = _reference(Q, K, V, attn_mask, Wq, Wk, Wv, Wfc, H)

    # exact-precision (f32) path
    out_f32 = jax.block_until_ready(
        multi_head_attention(Q, K, V, attn_mask, Wq, Wk, Wv, Wfc, H))
    assert jnp.allclose(out_f32, ref, atol=1e-4, rtol=1e-4), "f32 kernel mismatch"

    # MXU-native bf16 path (score/PV/fc matmuls + exp in bf16, f32 accumulation;
    # mask, softmax stats, residual and LayerNorm stay f32)
    out_bf16 = jax.block_until_ready(
        multi_head_attention(Q, K, V, attn_mask, Wq, Wk, Wv, Wfc, H,
                             compute_dtype=jnp.bfloat16))
    assert jnp.allclose(out_bf16, ref, atol=5e-2, rtol=5e-2), "bf16 kernel mismatch"

    print("KERNEL_OK")
</pallas_src>

<mosaic_0001>
module attributes {stable_mosaic.version = 11 : i64} {
  func.func @_attn_kernel(%arg0: i32, %arg1: i32, %arg2: memref<1x4x8x8xf32, #tpu.memory_space<vmem>>, %arg3: memref<1x4x8x8xf32, #tpu.memory_space<vmem>>, %arg4: memref<1x4x8x8xf32, #tpu.memory_space<vmem>>, %arg5: memref<1x8x8xi8, #tpu.memory_space<vmem>>, %arg6: memref<1x8x32xf32, #tpu.memory_space<vmem>>, %arg7: memref<32x32xf32, #tpu.memory_space<vmem>>, %arg8: memref<1x8x32xf32, #tpu.memory_space<vmem>>) attributes {dimension_semantics = [#tpu.dimension_semantics<parallel>, #tpu.dimension_semantics<parallel>], iteration_bounds = array<i64: 2, 1>, scalar_prefetch = 0 : i64, scratch_operands = 0 : i64, tpu.core_type = #tpu.core_type<tc>, window_params = [{transform_indices = @transform_0, window_bounds = array<i64: 1, 4, 8, 8>}, {transform_indices = @transform_1, window_bounds = array<i64: 1, 4, 8, 8>}, {transform_indices = @transform_2, window_bounds = array<i64: 1, 4, 8, 8>}, {transform_indices = @transform_3, window_bounds = array<i64: 1, 8, 8>}, {transform_indices = @transform_4, window_bounds = array<i64: 1, 8, 32>}, {pipeline_mode = #tpu.pipeline_mode<synchronous>, transform_indices = @transform_5, window_bounds = array<i64: 32, 32>}, {transform_indices = @transform_6, window_bounds = array<i64: 1, 8, 32>}]} {
    %c0 = arith.constant 0 : index
    %c0_0 = arith.constant 0 : index
    %c0_1 = arith.constant 0 : index
    %c0_2 = arith.constant 0 : index
    %0 = vector.load %arg2[%c0, %c0_0, %c0_1, %c0_2] : memref<1x4x8x8xf32, #tpu.memory_space<vmem>>, vector<1x4x8x8xf32>
    %1 = vector.shape_cast %0 : vector<1x4x8x8xf32> to vector<4x8x8xf32>
    %c0_3 = arith.constant 0 : index
    %c0_4 = arith.constant 0 : index
    %c0_5 = arith.constant 0 : index
    %c0_6 = arith.constant 0 : index
    %2 = vector.load %arg3[%c0_3, %c0_4, %c0_5, %c0_6] : memref<1x4x8x8xf32, #tpu.memory_space<vmem>>, vector<1x4x8x8xf32>
    %3 = vector.shape_cast %2 : vector<1x4x8x8xf32> to vector<4x8x8xf32>
    "tpu.trace_start"() <{level = 10 : i32, message = "bqd,bkd->bqk"}> : () -> ()
    %cst = arith.constant dense<0.000000e+00> : vector<4x8x8xf32>
    %4 = tpu.matmul %1, %3, %cst {dimension_numbers = #tpu.dot_dimension_numbers<[2], [2], [1], [1], [0, 0, 0, 1, 1, 1], [0], [0]>} : vector<4x8x8xf32>, vector<4x8x8xf32>, vector<4x8x8xf32> -> vector<4x8x8xf32>
    "tpu.trace_stop"() : () -> ()
    %5 = vector.shape_cast %4 : vector<4x8x8xf32> to vector<1x4x8x8xf32>
    %c0_7 = arith.constant 0 : index
    %c0_8 = arith.constant 0 : index
    %c0_9 = arith.constant 0 : index
    %6 = vector.load %arg5[%c0_7, %c0_8, %c0_9] : memref<1x8x8xi8, #tpu.memory_space<vmem>>, vector<1x8x8xi8>
    %7 = arith.sitofp %6 : vector<1x8x8xi8> to vector<1x8x8xf32>
    %8 = vector.shape_cast %7 : vector<1x8x8xf32> to vector<1x1x8x8xf32>
    %cst_10 = arith.constant 0.000000e+00 : f32
    %9 = vector.broadcast %cst_10 : f32 to vector<1x1x8x8xf32>
    %10 = arith.cmpf one, %8, %9 : vector<1x1x8x8xf32>
    %cst_11 = arith.constant -1.000000e+09 : f32
    %11 = vector.shape_cast %10 : vector<1x1x8x8xi1> to vector<1x1x8x8xi1>
    %12 = vector.broadcast %11 : vector<1x1x8x8xi1> to vector<1x4x8x8xi1>
    %13 = vector.broadcast %cst_11 : f32 to vector<1x4x8x8xf32>
    %14 = arith.select %12, %13, %5 : vector<1x4x8x8xi1>, vector<1x4x8x8xf32>
    %cst_12 = arith.constant dense<0xFF800000> : vector<1x4x8xf32>
    %15 = vector.multi_reduction <maximumf>, %14, %cst_12 [3] : vector<1x4x8x8xf32> to vector<1x4x8xf32>
    %16 = vector.shape_cast %15 : vector<1x4x8xf32> to vector<1x4x8x1xf32>
    %17 = vector.broadcast %16 : vector<1x4x8x1xf32> to vector<1x4x8x8xf32>
    %18 = arith.subf %14, %17 : vector<1x4x8x8xf32>
    %19 = math.exp %18 : vector<1x4x8x8xf32>
    %cst_13 = arith.constant dense<0.000000e+00> : vector<1x4x8xf32>
    %20 = vector.multi_reduction <add>, %19, %cst_13 [3] : vector<1x4x8x8xf32> to vector<1x4x8xf32>
    %21 = vector.shape_cast %20 : vector<1x4x8xf32> to vector<1x4x8x1xf32>
    %c0_14 = arith.constant 0 : index
    %c0_15 = arith.constant 0 : index
    %c0_16 = arith.constant 0 : index
    %c0_17 = arith.constant 0 : index
    %22 = vector.load %arg4[%c0_14, %c0_15, %c0_16, %c0_17] : memref<1x4x8x8xf32, #tpu.memory_space<vmem>>, vector<1x4x8x8xf32>
    %23 = vector.shape_cast %22 : vector<1x4x8x8xf32> to vector<4x8x8xf32>
    %24 = vector.shape_cast %19 : vector<1x4x8x8xf32> to vector<4x8x8xf32>
    "tpu.trace_start"() <{level = 10 : i32, message = "bqk,bkd->bqd"}> : () -> ()
    %cst_18 = arith.constant dense<0.000000e+00> : vector<4x8x8xf32>
    %25 = tpu.matmul %24, %23, %cst_18 {dimension_numbers = #tpu.dot_dimension_numbers<[2], [1], [1], [2], [0, 0, 0, 1, 1, 2], [0], [0]>} : vector<4x8x8xf32>, vector<4x8x8xf32>, vector<4x8x8xf32> -> vector<4x8x8xf32>
    "tpu.trace_stop"() : () -> ()
    %26 = vector.shape_cast %25 : vector<4x8x8xf32> to vector<1x4x8x8xf32>
    %27 = tpu.reciprocal %21 : vector<1x4x8x1xf32> -> vector<1x4x8x1xf32>
    %28 = vector.broadcast %27 : vector<1x4x8x1xf32> to vector<1x4x8x8xf32>
    %29 = arith.mulf %26, %28 : vector<1x4x8x8xf32>
    %30 = vector.extract_strided_slice %29 {offsets = [0, 0, 0, 0], sizes = [1, 1, 8, 8], strides = [1, 1, 1, 1]} : vector<1x4x8x8xf32> to vector<1x1x8x8xf32>
    %31 = vector.shape_cast %30 : vector<1x1x8x8xf32> to vector<1x8x8xf32>
    %32 = vector.extract_strided_slice %29 {offsets = [0, 1, 0, 0], sizes = [1, 1, 8, 8], strides = [1, 1, 1, 1]} : vector<1x4x8x8xf32> to vector<1x1x8x8xf32>
    %33 = vector.shape_cast %32 : vector<1x1x8x8xf32> to vector<1x8x8xf32>
    %34 = vector.extract_strided_slice %29 {offsets = [0, 2, 0, 0], sizes = [1, 1, 8, 8], strides = [1, 1, 1, 1]} : vector<1x4x8x8xf32> to vector<1x1x8x8xf32>
    %35 = vector.shape_cast %34 : vector<1x1x8x8xf32> to vector<1x8x8xf32>
    %36 = vector.extract_strided_slice %29 {offsets = [0, 3, 0, 0], sizes = [1, 1, 8, 8], strides = [1, 1, 1, 1]} : vector<1x4x8x8xf32> to vector<1x1x8x8xf32>
    %37 = vector.shape_cast %36 : vector<1x1x8x8xf32> to vector<1x8x8xf32>
    %38 = tpu.concatenate %31, %33, %35, %37 in 2 : vector<1x8x8xf32>, vector<1x8x8xf32>, vector<1x8x8xf32>, vector<1x8x8xf32> -> vector<1x8x32xf32>
    %39 = vector.shape_cast %38 : vector<1x8x32xf32> to vector<8x32xf32>
    %c0_19 = arith.constant 0 : index
    %c0_20 = arith.constant 0 : index
    %40 = vector.load %arg7[%c0_19, %c0_20] : memref<32x32xf32, #tpu.memory_space<vmem>>, vector<32x32xf32>
    %cst_21 = arith.constant dense<0.000000e+00> : vector<8x32xf32>
    %41 = tpu.matmul %39, %40, %cst_21 {dimension_numbers = #tpu.dot_dimension_numbers<[1], [0], [0], [1], [0, 0, 1, 1], [], []>} : vector<8x32xf32>, vector<32x32xf32>, vector<8x32xf32> -> vector<8x32xf32>
    %c0_22 = arith.constant 0 : index
    %c0_23 = arith.constant 0 : index
    %c0_24 = arith.constant 0 : index
    %42 = vector.load %arg6[%c0_22, %c0_23, %c0_24] : memref<1x8x32xf32, #tpu.memory_space<vmem>>, vector<1x8x32xf32>
    %43 = vector.shape_cast %42 : vector<1x8x32xf32> to vector<8x32xf32>
    %44 = arith.addf %41, %43 : vector<8x32xf32>
    %cst_25 = arith.constant dense<0.000000e+00> : vector<8xf32>
    %45 = vector.multi_reduction <add>, %44, %cst_25 [1] : vector<8x32xf32> to vector<8xf32>
    %46 = vector.shape_cast %45 : vector<8xf32> to vector<8x1xf32>
    %cst_26 = arith.constant 3.200000e+01 : f32
    %47 = vector.broadcast %cst_26 : f32 to vector<8x1xf32>
    %48 = arith.divf %46, %47 : vector<8x1xf32>
    %49 = vector.broadcast %48 : vector<8x1xf32> to vector<8x32xf32>
    %50 = arith.subf %44, %49 : vector<8x32xf32>
    %51 = arith.mulf %50, %50 : vector<8x32xf32>
    %cst_27 = arith.constant dense<0.000000e+00> : vector<8xf32>
    %52 = vector.multi_reduction <add>, %51, %cst_27 [1] : vector<8x32xf32> to vector<8xf32>
    %53 = vector.shape_cast %52 : vector<8xf32> to vector<8x1xf32>
    %cst_28 = arith.constant 3.200000e+01 : f32
    %54 = vector.broadcast %cst_28 : f32 to vector<8x1xf32>
    %55 = arith.divf %53, %54 : vector<8x1xf32>
    %56 = vector.broadcast %48 : vector<8x1xf32> to vector<8x32xf32>
    %57 = arith.subf %44, %56 : vector<8x32xf32>
    %cst_29 = arith.constant 9.99999974E-6 : f32
    %58 = vector.broadcast %cst_29 : f32 to vector<8x1xf32>
    %59 = arith.addf %55, %58 : vector<8x1xf32>
    %60 = math.rsqrt %59 : vector<8x1xf32>
    %61 = vector.broadcast %60 : vector<8x1xf32> to vector<8x32xf32>
    %62 = arith.mulf %57, %61 : vector<8x32xf32>
    %63 = vector.shape_cast %62 : vector<8x32xf32> to vector<1x8x32xf32>
    %c0_30 = arith.constant 0 : index
    %c0_31 = arith.constant 0 : index
    %c0_32 = arith.constant 0 : index
    %64 = vector.load %arg8[%c0_30, %c0_31, %c0_32] : memref<1x8x32xf32, #tpu.memory_space<vmem>>, vector<1x8x32xf32>
    tpu.vector_store %arg8[%c0_30, %c0_31, %c0_32], %63 {strides = array<i32>} : memref<1x8x32xf32, #tpu.memory_space<vmem>>, vector<1x8x32xf32>,
    return
  }
  func.func @transform_0(%arg0: i32, %arg1: i32) -> (i32, i32, i32, i32) {
    %c0_i32 = arith.constant 0 : i32
    %c0_i32_0 = arith.constant 0 : i32
    %c0_i32_1 = arith.constant 0 : i32
    return %arg0, %c0_i32, %arg1, %c0_i32_0 : i32, i32, i32, i32
  }
  func.func @transform_1(%arg0: i32, %arg1: i32) -> (i32, i32, i32, i32) {
    %c0_i32 = arith.constant 0 : i32
    %c0_i32_0 = arith.constant 0 : i32
    %c0_i32_1 = arith.constant 0 : i32
    %c0_i32_2 = arith.constant 0 : i32
    return %arg0, %c0_i32, %c0_i32_0, %c0_i32_1 : i32, i32, i32, i32
  }
  func.func @transform_2(%arg0: i32, %arg1: i32) -> (i32, i32, i32, i32) {
    %c0_i32 = arith.constant 0 : i32
    %c0_i32_0 = arith.constant 0 : i32
    %c0_i32_1 = arith.constant 0 : i32
    %c0_i32_2 = arith.constant 0 : i32
    return %arg0, %c0_i32, %c0_i32_0, %c0_i32_1 : i32, i32, i32, i32
  }
  func.func @transform_3(%arg0: i32, %arg1: i32) -> (i32, i32, i32) {
    %c0_i32 = arith.constant 0 : i32
    %c0_i32_0 = arith.constant 0 : i32
    return %arg0, %arg1, %c0_i32 : i32, i32, i32
  }
  func.func @transform_4(%arg0: i32, %arg1: i32) -> (i32, i32, i32) {
    %c0_i32 = arith.constant 0 : i32
    %c0_i32_0 = arith.constant 0 : i32
    return %arg0, %arg1, %c0_i32 : i32, i32, i32
  }
  func.func @transform_5(%arg0: i32, %arg1: i32) -> (i32, i32) {
    %c0_i32 = arith.constant 0 : i32
    %c0_i32_0 = arith.constant 0 : i32
    %c0_i32_1 = arith.constant 0 : i32
    return %c0_i32, %c0_i32_0 : i32, i32
  }
  func.func @transform_6(%arg0: i32, %arg1: i32) -> (i32, i32, i32) {
    %c0_i32 = arith.constant 0 : i32
    %c0_i32_0 = arith.constant 0 : i32
    return %arg0, %arg1, %c0_i32 : i32, i32, i32
  }
}

</mosaic_0001>

<bundles_post_ra>
// kernel: tpu_custom_call.1
= control target key start
LH: loop header
LB: loop body
LE: loop exit
PB: predicated region body
PF: predicated region fallthrough
CT: control target
= control target key end

     0   :  { %s2375_s0 = inlined_call_operand.hbm [shape: f32[2,4,8,8], index: 0, kind: input, shape index: {}]   ;;  %s2376_s1 = inlined_call_operand.hbm [shape: f32[2,4,8,8], index: 1, kind: input, shape index: {}]   ;;  %s2377_s2 = inlined_call_operand.hbm [shape: f32[2,4,8,8], index: 2, kind: input, shape index: {}]   ;;  %s2378_s3 = inlined_call_operand.vmem [shape: s8[2,8,8], index: 3, kind: input, shape index: {}]   ;;  %s2379_s4 = inlined_call_operand.hbm [shape: f32[2,8,32], index: 4, kind: input, shape index: {}]   ;;  %s2380_s5 = inlined_call_operand.hbm [shape: f32[32,32], index: 5, kind: input, shape index: {}]   ;;  %s2381_s6 = inlined_call_operand.hbm [shape: f32[2,8,32], index: 6, kind: output, shape index: {}]  }
   0x1   :  { %2396 = sst [smem:[#allocation22_spill]] %s2376_s1 }
   0x2   :  { %2397 = sst [smem:[#allocation23_spill]] %s2380_s5 }
   0x3   :  { %11 = vsyncpa [#allocation3], 0 }
   0x4   :  { %13 = vsyncpa [#allocation3 + $0x1], 0 }
   0x5   :  { %14 = vsyncpa [#allocation6], 0 }
   0x6   :  { %16 = vsyncpa [#allocation6 + $0x1], 0 }
   0x7   :  { %17 = vsyncpa [#allocation9], 0 }
   0x8   :  { %19 = vsyncpa [#allocation9 + $0x1], 0 }
   0x9   :  { %20 = vsyncpa [#allocation4], 0 }
   0xa   :  { %22 = vsyncpa [#allocation4 + $0x1], 0  ;;  %s1936_s21 = smov 0   ;;  %s1938_s22 = smov 0  }
   0xb   :  { %s1940_s23 = smov 0   ;;  %s1942_s24 = smov 0  }
   0xc   :  { %s1944_s25 = smov 0   ;;  %s1946_s26 = smov 0  }
   0xd LB: > { %2398 = sst [smem:[#allocation17_spill]] %s1865_s21  ;;  %s1967_s27 = sadd.s32 4294967295, %s1885_s26   ;;  %s1885_s26 = sphi %s1946_s26, %s28_s26   ;;  %s1881_s25 = sphi %s1944_s25, %s2437_s25   ;;  %s1877_s24 = sphi %s1942_s24, %s2436_s24   ;;  %s1873_s23 = sphi %s1940_s23, %s2432_s23   ;;  %s1869_s22 = sphi %s1938_s22, %s2435_s22   ;;  %s1865_s21 = sphi %s1936_s21, %s2434_s21  }
   0xe   : > { %2399 = sst [smem:[#allocation18_spill]] %s1873_s23  ;;  %s1408_s28 = sadd.s32 4294967294, %s1885_s26  }
   0xf   : > { %p56_p0 = scmp.ne.s32.totalorder %s1873_s23, %s1869_s22  ;;  %p57_p1 = scmp.eq.s32.totalorder %s1885_s26, 0 }
  0x10   : > { %p62_p2 = scmp.ne.s32.totalorder %s1869_s22, %s1865_s21  ;;  %p2382_p3 = scmp.eq.s32.totalorder %s1967_s27, 0 }
  0x11   : > { %p217_p4 = scmp.eq.s32.totalorder %s1967_s27, 1  ;;  %p1978_p5 = por %p57_p1, %p56_p0 }
  0x12   : > { %p223_p6 = scmp.eq.s32.totalorder %s1408_s28, 1  ;;  %p1984_p7 = por %p2382_p3, %p62_p2 }
  0x13   : > { %s2400_s30 = scalar_select %p1978_p5, 1, 0 }
  0x14   : > { %s2401_s7 = scalar_select %p1984_p7, 1, 0 }
  0x15   : > { %p1988_p8 = por %p217_p4, %p56_p0  ;;  %p1992_p9 = por %p223_p6, %p62_p2 }
  0x16   : > { %p1409_p10 = scmp.ge.s32.totalorder %s1885_s26, 1  ;;  %p230_p11 = scmp.lt.s32.totalorder %s1885_s26, 3 }
  0x17   : > { %s2402_s8 = scalar_select %p1988_p8, 1, 0 }
  0x18   : > { %s2403_s9 = scalar_select %p1992_p9, 1, 0 }
  0x19   : > { %p1998_p12 = pnand %p1409_p10, %p230_p11  ;;  %s1887_s11 = smov [#allocation10]  }
  0x1a   : > { %2404 = sst [smem:[#allocation19_spill]] %s2403_s9  ;;  %s242_s12 = sshll.u32 %s1887_s11, 4  ;;  %s2002_s12 = int_to_ptr.vmem [resolvable:$true] %s242_s12 }
  0x1b   : > { %s2405_s10 = scalar_select %p1998_p12, 1, 0 }
  0x1c   : > { %p1543_p13 = pneg %p1998_p12  ;;  %s40_s14 = sadd.s32 1, %s1881_s25 }
  0x1d   : > { %s2016_s15 = sand.u32 1, %s1873_s23   ;;  %p2018_p4 = scmp.ge.s32.totalorder %s40_s14, 2 }
  0x1e   : > { %p2010_p2 = pnand %p1543_p13, %p2382_p3  ;;  %s2408_s5 = sld [smem:[#allocation23_spill]] }
  0x1f   : > { %s2407_s16 = scalar_select %p2018_p4, 1, 0 }
  0x20   : > { %p1645_p10 = pneg %p2010_p2 }
  0x24   : > { %s1643_s19 = scalar_lea.hbm %s2408_s5, 512 }
  0x25   : > { %p1644_p6 = scmp.ne.s32.totalorder %s2408_s5, %s1643_s19  ;;  %p1650_p0 = scmp.lt.u32.totalorder %s1643_s19, %s2408_s5 }
  0x27   : > { %p1646_p11 = pnand %p1645_p10, %p1644_p6 }
  0x29   : > { %p1647_p13 = pneg %p1646_p11 }
  0x2b   : > { %p1652_p3 = pnand %p1650_p0, %p1647_p13 }
  0x2d   : > { %1655 = shalt.err (!%p1652_p3)
}
  0x2e   : > { %s1656_s9 = scalar_lea.vmem %s2002_s12, 512  ;;  %p1664_p7 = scmp.lt.s32.totalorder %s2002_s12, %s2002_s12 }
  0x2f   : > { %p1657_p1 = scmp.ne.s32.totalorder %s2002_s12, %s1656_s9  ;;  %p1665_p12 = scmp.lt.s32.totalorder %s1656_s9, %s1656_s9 }
  0x31   : > { %p1659_p9 = pnand %p1657_p1, %p1645_p10  ;;  %p1666_p5 = por %p1665_p12, %p1664_p7 }
  0x33   : > { %p1660_p8 = pneg %p1659_p9 }
  0x35   : > { %p1667_p4 = pnand %p1666_p5, %p1660_p8 }
  0x37   : > { %1670 = shalt.err (!%p1667_p4)
}
  0x38   : > { %s2387_s17 = smov 128   ;;  %s2389_s29 = smov 8  }
  0x39   : > { %1546 = dma.hbm_to_vmem [thread:$0]  (!%p2010_p2), %s2408_s5, 512, %s2002_s12, [#allocation9], %s2387_s17, %s2387_s17, %s2389_s29  }
  0x3a   : > { %p2409_p3 = scmp.ne.s32.totalorder %s2407_s16, 0  ;;  %s2051_s19 = sshll.u32 %s2016_s15, 5 }
  0x3b   : > { %s2054_s20 = sshll.u32 %s1881_s25, 9  ;;  %p2411_p5 = scmp.ne.s32.totalorder %s2400_s30, 0 }
  0x3c   : > { %s2439_s14 = smov (%p2409_p3, %s40_s14), 0  ;;  %p2412_p7 = scmp.lt.s32.totalorder %s1885_s26, 2 }
  0x3d   : > { %2410 = sst [smem:[#allocation20_spill]] %s2439_s14  ;;  %s44_s28 = ssub.s32 %s1881_s25, %s2439_s14 }
  0x3e   : > { %p2062_p8 = pnand %p2412_p7, %p2411_p5  ;;  %p47_p9 = scmp.eq.s32.totalorder %s44_s28, 0 }
  0x3f   : > { %s2392_s12 = sand.u32 1, %s1885_s26   ;;  %s2414_s16 = sadd.s32 1, %s1873_s23 }
  0x40   : > { %s2413_s13 = scalar_select %p2062_p8, 1, 0 }
  0x41   : > { %s2070_s11 = scalar_select %p47_p9, %s1873_s23, %s2414_s16  }
  0x42   : > { %s2416_s1 = sld [smem:[#allocation22_spill]]  ;;  %s282_s30 = scalar_lea.vmem [#allocation5], %s2051_s19 }
  0x43   : > { %2415 = sst [smem:[#allocation21_spill]] %s2070_s11  ;;  %s289_s29 = sshll.u32 %s282_s30, 4  ;;  %s2079_s29 = int_to_ptr.vmem [resolvable:$true] %s289_s29 }
  0x44   : > { %s2083_s5 = scalar_lea.sflag [#allocation6], %s2392_s12  ;;  %p2089_p0 = pneg %p2062_p8 }
  0x48   : > { %s2076_s17 = scalar_lea.hbm %s2416_s1, %s2054_s20  ;;  %s1676_s30 = scalar_lea.hbm %s2416_s1, 1024 }
  0x49   : > { %s1671_s28 = scalar_lea.hbm %s2076_s17, 512  ;;  %p1677_p4 = scmp.lt.u32.totalorder %s2076_s17, %s2416_s1 }
  0x4a   : > { %p1672_p12 = scmp.ne.s32.totalorder %s2076_s17, %s1671_s28  ;;  %p1678_p6 = scmp.lt.u32.totalorder %s1676_s30, %s1671_s28 }
  0x4b   : > { %p1680_p11 = scmp.lt.u32.totalorder %s1671_s28, %s2076_s17 }
  0x4c   : > { %p1674_p1 = pnand %p2089_p0, %p1672_p12  ;;  %p1679_p10 = por %p1678_p6, %p1677_p4 }
  0x4e   : > { %p1675_p2 = pneg %p1674_p1  ;;  %p1681_p13 = por %p1680_p11, %p1679_p10 }
  0x50   : > { %p1682_p3 = pnand %p1681_p13, %p1675_p2 }
  0x52   : > { %1685 = shalt.err (!%p1682_p3)
}
  0x53   : > { %s1686_s12 = scalar_lea.vmem %s2079_s29, 512  ;;  %s1890_s9 = smov [#allocation5]  }
  0x54   : > { %p1687_p5 = scmp.ne.s32.totalorder %s2079_s29, %s1686_s12  ;;  %s1691_s18 = sshll.u32 %s1890_s9, 4  ;;  %s1692_s18 = int_to_ptr.vmem [resolvable:$false] %s1691_s18 }
  0x55   : > { %s1693_s14 = scalar_lea.vmem %s1692_s18, 1024  ;;  %p1694_p12 = scmp.lt.s32.totalorder %s2079_s29, %s1692_s18 }
  0x56   : > { %p1689_p7 = pnand %p1687_p5, %p2089_p0  ;;  %p1695_p1 = scmp.lt.s32.totalorder %s1693_s14, %s1686_s12 }
  0x58   : > { %p1690_p9 = pneg %p1689_p7  ;;  %p1696_p4 = por %p1695_p1, %p1694_p12 }
  0x5a   : > { %p1697_p6 = pnand %p1696_p4, %p1690_p9 }
  0x5c   : > { %1700 = shalt.err (!%p1697_p6)
}
  0x5d   : > { %s2418_s11 = smov 8   ;;  %s2419_s28 = smov 128  }
  0x5e   : > { %1553 = dma.hbm_to_vmem [thread:$0]  (!%p2062_p8), %s2076_s17, 512, %s2079_s29, %s2083_s5, %s2419_s28, %s2419_s28, %s2418_s11  }
  0x5f   : > { %s2120_s12 = scalar_lea.hbm %s2375_s0, %s2054_s20  ;;  %s260_s18 = scalar_lea.vmem [#allocation2], %s2051_s19 }
  0x60   : > { %s268_s14 = sshll.u32 %s260_s18, 4  ;;  %s257_s1 = scalar_lea.sflag [#allocation3], %s2016_s15  ;;  %s2123_s14 = int_to_ptr.vmem [resolvable:$true] %s268_s14 }
  0x61   : > { %s1701_s23 = scalar_lea.hbm %s2120_s12, 512  ;;  %s1706_s30 = scalar_lea.hbm %s2375_s0, 1024 }
  0x62   : > { %p1702_p2 = scmp.ne.s32.totalorder %s2120_s12, %s1701_s23  ;;  %p1707_p13 = scmp.lt.u32.totalorder %s2120_s12, %s2375_s0 }
  0x63   : > { %p1708_p3 = scmp.lt.u32.totalorder %s1706_s30, %s1701_s23  ;;  %p1710_p7 = scmp.lt.u32.totalorder %s1701_s23, %s2120_s12 }
  0x64   : > { %p1704_p10 = pnand %p1702_p2, %p2089_p0 }
  0x65   : > { %p1709_p5 = por %p1708_p3, %p1707_p13 }
  0x66   : > { %p1705_p11 = pneg %p1704_p10 }
  0x67   : > { %p1711_p9 = por %p1710_p7, %p1709_p5 }
  0x69   : > { %p1712_p12 = pnand %p1711_p9, %p1705_p11 }
  0x6b   : > { %1715 = shalt.err (!%p1712_p12)
}
  0x6c   : > { %s1716_s18 = scalar_lea.vmem %s2123_s14, 512  ;;  %s1891_s17 = smov [#allocation2]  }
  0x6d   : > { %p1717_p1 = scmp.ne.s32.totalorder %s2123_s14, %s1716_s18  ;;  %s1721_s29 = sshll.u32 %s1891_s17, 4  ;;  %s1722_s29 = int_to_ptr.vmem [resolvable:$false] %s1721_s29 }
  0x6e   : > { %s1723_s21 = scalar_lea.vmem %s1722_s29, 1024  ;;  %p1724_p2 = scmp.lt.s32.totalorder %s2123_s14, %s1722_s29 }
  0x6f   : > { %p1719_p4 = pnand %p1717_p1, %p2089_p0  ;;  %p1725_p10 = scmp.lt.s32.totalorder %s1723_s21, %s1716_s18 }
  0x71   : > { %p1720_p6 = pneg %p1719_p4  ;;  %p1726_p13 = por %p1725_p10, %p1724_p2 }
  0x73   : > { %p1727_p3 = pnand %p1726_p13, %p1720_p6 }
  0x75   : > { %1730 = shalt.err (!%p1727_p3)
}
  0x76   : > { %1550 = dma.hbm_to_vmem [thread:$0]  (!%p2062_p8), %s2120_s12, 512, %s2123_s14, %s257_s1, %s2419_s28, %s2419_s28, %s2418_s11  }
  0x77   : > { %s2156_s9 = scalar_lea.hbm %s2377_s2, %s2054_s20  ;;  %s303_s18 = scalar_lea.vmem [#allocation7], %s2051_s19 }
  0x78   : > { %s310_s17 = sshll.u32 %s303_s18, 4  ;;  %s1731_s29 = scalar_lea.hbm %s2156_s9, 512  ;;  %s2159_s17 = int_to_ptr.vmem [resolvable:$true] %s310_s17 }
  0x79   : > { %p1732_p11 = scmp.ne.s32.totalorder %s2156_s9, %s1731_s29  ;;  %s1736_s12 = scalar_lea.hbm %s2377_s2, 1024 }
  0x7a   : > { %p1737_p9 = scmp.lt.u32.totalorder %s2156_s9, %s2377_s2  ;;  %p1738_p12 = scmp.lt.u32.totalorder %s1736_s12, %s1731_s29 }
  0x7b   : > { %p1734_p5 = pnand %p1732_p11, %p2089_p0  ;;  %p1740_p4 = scmp.lt.u32.totalorder %s1731_s29, %s2156_s9 }
  0x7c   : > { %p1739_p1 = por %p1738_p12, %p1737_p9 }
  0x7d   : > { %p1735_p7 = pneg %p1734_p5 }
  0x7e   : > { %p1741_p6 = por %p1740_p4, %p1739_p1 }
  0x80   : > { %p1742_p2 = pnand %p1741_p6, %p1735_p7 }
  0x82   : > { %1745 = shalt.err (!%p1742_p2)
}
  0x83   : > { %s1746_s19 = scalar_lea.vmem %s2159_s17, 512  ;;  %s1892_s23 = smov [#allocation7]  }
  0x84   : > { %p1747_p10 = scmp.ne.s32.totalorder %s2159_s17, %s1746_s19  ;;  %s1751_s30 = sshll.u32 %s1892_s23, 4  ;;  %s1752_s30 = int_to_ptr.vmem [resolvable:$false] %s1751_s30 }
  0x85   : > { %s1753_s18 = scalar_lea.vmem %s1752_s30, 1024  ;;  %p1754_p11 = scmp.lt.s32.totalorder %s2159_s17, %s1752_s30 }
  0x86   : > { %p1749_p13 = pnand %p1747_p10, %p2089_p0  ;;  %p1755_p5 = scmp.lt.s32.totalorder %s1753_s18, %s1746_s19 }
  0x88   : > { %p1750_p3 = pneg %p1749_p13  ;;  %p1756_p9 = por %p1755_p5, %p1754_p11 }
  0x8a   : > { %p1757_p12 = pnand %p1756_p9, %p1750_p3 }
  0x8c   : > { %1760 = shalt.err (!%p1757_p12)
}
  0x8d   : > { %1556 = dma.hbm_to_vmem [thread:$0]  (!%p2062_p8), %s2156_s9, 512, %s2159_s17, %s2083_s5, %s2419_s28, %s2419_s28, %s2418_s11  }
  0x8e   : > { %s1421_s29 = sshll.u32 %s2016_s15, 3  ;;  %s1422_s21 = sshll.u32 %s1881_s25, 7 }
  0x8f   : > { %s2191_s14 = scalar_lea.hbm %s2379_s4, %s1422_s21  ;;  %s334_s20 = scalar_lea.vmem [#allocation8], %s1421_s29 }
  0x90   : > { %s342_s19 = sshll.u32 %s334_s20, 4  ;;  %s2420_s23 = sand.u32 1, %s1885_s26   ;;  %s343_s19 = int_to_ptr.vmem [resolvable:$true] %s342_s19 }
  0x91   : > { %s331_s30 = scalar_lea.sflag [#allocation9], %s2420_s23  ;;  %s1761_s18 = scalar_lea.hbm %s2191_s14, 128 }
  0x92   : > { %p1762_p7 = scmp.ne.s32.totalorder %s2191_s14, %s1761_s18  ;;  %s1766_s11 = scalar_lea.hbm %s2379_s4, 256 }
  0x93   : > { %p1767_p6 = scmp.lt.u32.totalorder %s2191_s14, %s2379_s4  ;;  %p1768_p2 = scmp.lt.u32.totalorder %s1766_s11, %s1761_s18 }
  0x94   : > { %p1764_p1 = pnand %p1762_p7, %p2089_p0  ;;  %p1770_p13 = scmp.lt.u32.totalorder %s1761_s18, %s2191_s14 }
  0x95   : > { %p1769_p10 = por %p1768_p2, %p1767_p6 }
  0x96   : > { %p1765_p4 = pneg %p1764_p1 }
  0x97   : > { %p1771_p3 = por %p1770_p13, %p1769_p10 }
  0x99   : > { %p1772_p11 = pnand %p1771_p3, %p1765_p4 }
  0x9b   : > { %1775 = shalt.err (!%p1772_p11)
}
  0x9c   : > { %s1776_s17 = scalar_lea.vmem %s343_s19, 128  ;;  %s1893_s29 = smov [#allocation8]  }
  0x9d   : > { %p1777_p5 = scmp.ne.s32.totalorder %s343_s19, %s1776_s17  ;;  %s1781_s21 = sshll.u32 %s1893_s29, 4  ;;  %s1782_s21 = int_to_ptr.vmem [resolvable:$false] %s1781_s21 }
  0x9e   : > { %s1783_s1 = scalar_lea.vmem %s1782_s21, 256  ;;  %p1784_p7 = scmp.lt.s32.totalorder %s343_s19, %s1782_s21 }
  0x9f   : > { %p1779_p9 = pnand %p1777_p5, %p2089_p0  ;;  %p1785_p1 = scmp.lt.s32.totalorder %s1783_s1, %s1776_s17 }
  0xa1   : > { %p1780_p12 = pneg %p1779_p9  ;;  %p1786_p8 = por %p1785_p1, %p1784_p7 }
  0xa3   : > { %p1787_p2 = pnand %p1786_p8, %p1780_p12 }
  0xa5   : > { %1790 = shalt.err (!%p1787_p2)
}
  0xa6   : > { %p2421_p6 = scmp.ne.s32.totalorder %s2413_s13, 0  ;;  %p2422_p4 = scmp.ne.s32.totalorder %s2405_s10, 0 }
  0xa7   : > { %s2215_s16 = sand.u32 (!%p2422_p4), 1, %s1869_s22   ;;  %p2423_p0 = scmp.ne.s32.totalorder (!%p2422_p4), %s2401_s7, 0 }
  0xa8   : > { %1559 = dma.hbm_to_vmem [thread:$0]  (!%p2421_p6), %s2191_s14, 128, %s343_s19, %s331_s30  }
  0xa9   : > { %351 = sbr.rel (%p2422_p4) target bundleno = 1439 (0x59f), region = 44  ;;  %s1424_s12 = sshll.u32 (!%p2422_p4), %s2215_s16, 5 }
  0xaa   : > { %s354_s20 = scalar_lea.sflag (!%p2422_p4), [#allocation3], %s2215_s16  ;;  %s2219_s23 = scalar_lea.vmem (!%p2422_p4), [#allocation2], %s1424_s12 }
  0xb0   : > { %1844 = dma.done.wait (%p2423_p0), %s354_s20, 512  }
  0xb1   : > { %1846 = vsyncadd (%p2423_p0), %s354_s20, 4294966784  ;;  %s362_s13 = sand.u32 1, %s1967_s27   ;;  %s2226_s14 = scalar_lea.vmem [#allocation5], %s1424_s12 }
  0xb2   : > { %s363_s10 = scalar_lea.sflag [#allocation6], %s362_s13 }
  0xb3   : > { %1848 = dma.done.wait (%p2423_p0), %s363_s10, 1024  }
  0xb4   : > { %1850 = vsyncadd (%p2423_p0), %s363_s10, 4294966272  ;;  %s1427_s19 = sshll.u32 %s2215_s16, 3  ;;  %s2233_s30 = scalar_lea.vmem [#allocation7], %s1424_s12 }
  0xb5   : > { %s381_s18 = scalar_lea.sflag [#allocation9], %s362_s13  ;;  %s2237_s5 = scalar_lea.vmem [#allocation8], %s1427_s19 }
  0xb6   : > { %1852 = dma.done.wait (%p2423_p0), %s381_s18, 128  }
  0xb7   : > { %1854 = vsyncadd (%p2423_p0), %s381_s18, 4294967168  ;;  %p2424_p8 = scmp.eq.s32.totalorder %s1967_s27, 0 }
  0xb9   : > { %1856 = dma.done.wait (%p2424_p8), [#allocation9], 512   ;;  %p2425_p10 = pmov %p2424_p8 }
  0xba   : > { %v1894_v0 = vmov 0.0   ;;  %vm1895_vm0 = vmmov 0   ;;  %vm454_vm1 = vcmask 64512   ;;  %v450_v1 = vld [vmem:[%s2226_s14] sm:$0xff]  ;;  %v452_v2 = vld [vmem:[%s2226_s14 + $0x10] sm:$0xff]  ;;  %v451_v5 = vld [vmem:[%s2226_s14 + $0x8] sm:$0xff] }
  0xbb   : > { %1858 = vsyncadd (%p2425_p10), [#allocation9], 4294966784  ;;  %1472 = vmatprep.subr.mxu1 %v1894_v0  ;;  %1482 = vmatprep.subr.mxu0 %v1894_v0  ;;  %v446_v3 = vld [vmem:[%s2219_s23] sm:$0xff]  ;;  %v448_v4 = vld [vmem:[%s2219_s23 + $0x10] sm:$0xff]  ;;  %p439_p13 = scmp.lt.s32.totalorder %s1877_s24, 1  ;;  %v1896_v54 = vmov 0.0|0.0  }
  0xbc   : > { %1474 = vmatprep.mubr.msk.f32.mxu1 %vm1895_vm0, %v1894_v0  ;;  %1484 = vmatprep.mubr.msk.f32.mxu0 %vm1895_vm0, %v1894_v0  ;;  %v447_v6 = vld [vmem:[%s2219_s23 + $0x8] sm:$0xff]  ;;  %v453_v7 = vld [vmem:[%s2226_s14 + $0x18] sm:$0xff]  ;;  %v805_v28 = vld [vmem:[%s2233_s30] sm:$0xff]  ;;  %s1897_s9 = smov 8   ;;  %s1898_s17 = smov 16   ;;  %vm1122_vm3 = vcmask 130048  }
  0xbd   : > { %1473 = vmatpush3.xpose.msk.msra.mxu1 %vm454_vm1, %v450_v1  ;;  %1483 = vmatpush3.xpose.msk.msra.mxu0 %vm454_vm1, %v452_v2  ;;  %v449_v8 = vld [vmem:[%s2219_s23 + $0x18] sm:$0xff]  ;;  %s440_s27 = scalar_select %p439_p13, %s1877_s24, 1  ;;  %v806_v29 = vld [vmem:[%s2233_s30 + $0x8] sm:$0xff]  ;;  %v807_v43 = vld [vmem:[%s2233_s30 + $0x10] sm:$0xff]  ;;  %vm1124_vm4 = vcmask 195584   ;;  %vm1131_vm5 = vcmask 261120  }
  0xbe   : > { %1477 = vmatprep.subr.mxu1 %v1894_v0  ;;  %1492 = vmatprep.subr.mxu0 %v1894_v0  ;;  %v808_v46 = vld [vmem:[%s2233_s30 + $0x18] sm:$0xff]  ;;  %v1126_v52 = vld [vmem:[#allocation10] sm:$0xff]  ;;  %v1128_v58 = vld [vmem:[#allocation10 + $0x10] sm:$0xff]  ;;  %s1899_s29 = smov 24   ;;  %s1445_s21 = sshll.u32 %s1877_s24, 7 }
  0xbf   : > { %s1430_s7 = sshll.u32 %s440_s27, 1  ;;  %v1127_v53 = vld [vmem:[#allocation10 + $0x8] sm:$0xff]  ;;  %v1129_v59 = vld [vmem:[#allocation10 + $0x18] sm:$0xff]  ;;  %s438_s1 = scalar_lea.vmem [#allocation11], %s1427_s19 }
  0xc0   : > { %1475 = vmatmul.mubr.msk.f32.vlgmr.msra.gmra.mrb[0].mxu1 %vm454_vm1, %v446_v3  ;;  %1485 = vmatmul.mubr.msk.f32.vlgmr.msra.gmra.mrb[0].mxu0 %vm454_vm1, %v448_v4  ;;  %s445_s28 = scalar_lea.vmem %s2378_s3, %s1430_s7  ;;  %v1524_v55 = vpack.c.bf16 %v1127_v53, %v1126_v52  ;;  %v1527_v61 = vpack.c.bf16 %v1129_v59, %v1128_v58  ;;  %s1235_s12 = sshll.u32 %s438_s1, 4  ;;  %s2327_s12 = int_to_ptr.vmem [resolvable:$true] %s1235_s12 }
  0xc1   : > { %1478 = vmatpush3.xpose.msk.msra.mxu1 %vm454_vm1, %v451_v5  ;;  %1479 = vmatprep.mubr.msk.f32.mxu1 %vm1895_vm0, %v1894_v0  ;;  %v759_v9 = vld [vmem:[%s445_s28] sm:$0x3]  ;;  %s2325_s13 = scalar_lea.hbm %s2381_s6, %s1445_s21  ;;  %s1221_s10 = scalar_lea.sflag [#allocation4], %s2215_s16 }
  0xc2   : > { %1487 = vmatprep.subr.mxu1 %v1894_v0  ;;  %1494 = vmatprep.mubr.msk.f32.mxu0 %vm1895_vm0, %v1894_v0  ;;  %v760_v10 = vunpack.c.0.s8 %v759_v9  ;;  %s1791_s14 = scalar_lea.vmem %s2327_s12, 128  ;;  %p2426_p11 = scmp.ne.s32.totalorder %s2402_s8, 0 }
  0xc3   : > { %1493 = vmatpush3.msra.mxu0 %v805_v28  ;;  %p1792_p3 = scmp.ne.s32.totalorder %s2327_s12, %s1791_s14  ;;  %s1900_s24 = smov [#allocation11]  }
  0xc4   : > { %1480 = vmatmul.mubr.msk.f32.vlgmr.msra.gmra.mrb[2].mxu1 %vm454_vm1, %v447_v6  ;;  %v761_v11 = vcvt.s32.f32 %v760_v10  ;;  %1502 = vmatprep.subr.mxu0 %v1894_v0  ;;  %s1795_s19 = sshll.u32 %s1900_s24, 4  ;;  %s1796_s19 = int_to_ptr.vmem [resolvable:$false] %s1795_s19 }
  0xc5   : > { %1488 = vmatpush3.xpose.msk.msra.mxu1 %vm454_vm1, %v453_v7  ;;  %1489 = vmatprep.mubr.msk.f32.mxu1 %vm1895_vm0, %v1894_v0  ;;  %p1793_p5 = pnand %p1792_p3, %p2426_p11  ;;  %s1797_s30 = scalar_lea.vmem %s1796_s19, 256 }
  0xc6   : > { %1497 = vmatprep.subr.mxu1 %v1894_v0  ;;  %vm762_vm2 = vcmp.ne.f32.partialorder %v761_v11, 0.0  ;;  %p1798_p12 = scmp.lt.s32.totalorder %s2327_s12, %s1796_s19  ;;  %p1799_p7 = scmp.lt.s32.totalorder %s1797_s30, %s1791_s14 }
  0xc7   : > { %p1794_p9 = pneg %p1793_p5 }
  0xc8   : > { %1490 = vmatmul.mubr.msk.f32.vlgmr.msra.gmra.mrb[4].mxu1 %vm454_vm1, %v449_v8  ;;  %p1800_p1 = por %p1799_p7, %p1798_p12 }
  0xc9   : > { %1499 = vmatprep.mubr.msk.f32.mxu1 %vm1895_vm0, %v1894_v0  ;;  %1498 = vmatpush3.msra.mxu1 %v806_v29 }
  0xca   : > { %1507 = vmatprep.subr.mxu1 %v1894_v0  ;;  %p1801_p2 = pnand %p1800_p1, %p1794_p9 }
 0x193   : > { %v527_v12 = vpop.f32.mrb[0].mxu1  ;;  %v679_v13 = vpop.f32.mrb[0].mxu0 }
 0x194   : > { %v765_v14 = vsel %vm762_vm2, -1e+09, %v527_v12  ;;  %v767_v15 = vsel %vm762_vm2, -1e+09, %v679_v13  ;;  %v1476_v16 = vpop.f32.mrb[1].mxu1  ;;  %v1486_v17 = vpop.f32.mrb[1].mxu0 }
 0x195   : > { %v775_v18 = vsel %vm454_vm1, %v767_v15, -inf  ;;  %v769_v19 = vsel %vm454_vm1, %v765_v14, -inf }
 0x196   : > { %776 = vmax.xlane.f32.xlu1 %v775_v18  ;;  %770 = vmax.xlane.f32.xlu0 %v769_v19 }
 0x197   : > { %v603_v20 = vpop.f32.mrb[2].mxu1 }
 0x198   : > { %v766_v21 = vsel %vm762_vm2, -1e+09, %v603_v20  ;;  %v1481_v22 = vpop.f32.mrb[3].mxu1 }
 0x199   : > { %v772_v23 = vsel %vm454_vm1, %v766_v21, -inf }
 0x19a   : > { %773 = vmax.xlane.f32.xlu0 %v772_v23 }
 0x19b   : > { %v755_v24 = vpop.f32.mrb[4].mxu1 }
 0x19c   : > { %v768_v25 = vsel %vm762_vm2, -1e+09, %v755_v24  ;;  %v1491_v26 = vpop.f32.mrb[5].mxu1 }
 0x19d   : > { %v778_v27 = vsel %vm454_vm1, %v768_v25, -inf }
 0x19e   : > { %779 = vmax.xlane.f32.xlu1 %v778_v27 }
 0x223   : > { %v777_v30 = vpop.xlane.xlu1 %776  ;;  %v771_v31 = vpop.xlane.xlu0 %770 }
 0x224   : > { %v783_v32 = vsub.f32 %v767_v15, %v777_v30  ;;  %v781_v33 = vsub.f32 %v765_v14, %v771_v31 }
 0x226   : > { %v789_v34 = vmul.f32 1.442695, %v783_v32  ;;  %v785_v35 = vmul.f32 1.442695, %v781_v33 }
 0x227   : > { %v774_v36 = vpop.xlane.xlu0 %773 }
 0x228   : > { %1625 = vpow2.f32 %v789_v34  ;;  %v782_v37 = vsub.f32 %v766_v21, %v774_v36  ;;  %v1130_v21 = vld [vmem:[%s2237_s5] sm:$0xff] }
 0x229   : > { %1627 = vpow2.f32 %v785_v35 }
 0x22a   : > { %v787_v38 = vmul.f32 1.442695, %v782_v37 }
 0x22b   : > { %v780_v39 = vpop.xlane.xlu1 %779 }
 0x22c   : > { %1629 = vpow2.f32 %v787_v38  ;;  %v784_v40 = vsub.f32 %v768_v25, %v780_v39 }
 0x22e   : > { %v791_v41 = vmul.f32 1.442695, %v784_v40 }
 0x230   : > { %1631 = vpow2.f32 %v791_v41 }
 0x232   : > { %v1626_v42 = vpop.eup %1625 }
 0x233   : > { %v1628_v44 = vpop.eup %1627  ;;  %v799_v45 = vsel %vm454_vm1, %v1626_v42, 0.0 }
 0x234   : > { %1495 = vmatmul.mubr.msk.f32.vlgmr.msra.gmra.mrb[2].mxu0 %vm454_vm1, %v1628_v44  ;;  %800 = vadd.xlane.f32.xlu1 %v799_v45  ;;  %v793_v49 = vsel %vm454_vm1, %v1628_v44, 0.0 }
 0x235   : > { %1503 = vmatpush3.msra.mxu0 %v807_v43  ;;  %1504 = vmatprep.mubr.msk.f32.mxu0 %vm1895_vm0, %v1894_v0 }
 0x236   : > { %v1630_v47 = vpop.eup %1629  ;;  %1523 = vmatprep.subr.bf16.mxu0 %v1896_v54 }
 0x237   : > { %1500 = vmatmul.mubr.msk.f32.vlgmr.msra.gmra.mrb[6].mxu1 %vm454_vm1, %v1630_v47  ;;  %v796_v48 = vsel %vm454_vm1, %v1630_v47, 0.0 }
 0x238   : > { %1505 = vmatmul.mubr.msk.f32.vlgmr.msra.gmra.mrb[4].mxu0 %vm454_vm1, %v1626_v42  ;;  %1508 = vmatpush3.msra.mxu1 %v808_v46 }
 0x239   : > { %797 = vadd.xlane.f32.xlu0 %v796_v48  ;;  %794 = vadd.xlane.f32.xlu1 %v793_v49 }
 0x23a   : > { %v1632_v50 = vpop.eup %1631  ;;  %1509 = vmatprep.mubr.msk.f32.mxu1 %vm1895_vm0, %v1894_v0  ;;  %1520 = vmatprep.mubr.msk.f32.mxu0 %vm1895_vm0, %v1894_v0 }
 0x23b   : > { %1510 = vmatmul.mubr.msk.f32.vlgmr.msra.gmra.mrb[8].mxu1 %vm454_vm1, %v1632_v50  ;;  %v802_v51 = vsel %vm454_vm1, %v1632_v50, 0.0  ;;  %1525 = vmatpush3.bf16.msra.mxu0 %v1524_v55 }
 0x23c   : > { %1526 = vmatprep.subr.bf16.mxu0 %v1896_v54 }
 0x23d   : > { %803 = vadd.xlane.f32.xlu0 %v802_v51 }
 0x23f   : > { %1528 = vmatpush3.bf16.msra.mxu0 %v1527_v61 }
 0x2c1   : > { %v801_v57 = vpop.xlane.xlu1 %800 }
 0x2c6   : > { %v798_v56 = vpop.xlane.xlu0 %797  ;;  %v795_v12 = vpop.xlane.xlu1 %794 }
 0x2c7   : > { %1633 = vrcp.f32 %v798_v56 }
 0x2c8   : > { %1635 = vrcp.f32 %v801_v57 }
 0x2ca   : > { %v804_v60 = vpop.xlane.xlu0 %803 }
 0x2cb   : > { %1637 = vrcp.f32 %v804_v60 }
 0x2cc   : > { %1639 = vrcp.f32 %v795_v12 }
 0x2d1   : > { %v1634_v0 = vpop.eup %1633 }
 0x2d2   : > { %v1636_v2 = vpop.eup %1635 }
 0x2d5   : > { %v1638_v8 = vpop.eup %1637 }
 0x2d6   : > { %v1640_v13 = vpop.eup %1639 }
 0x307   : > { %v878_v62 = vpop.f32.mrb[2].mxu0 }
 0x308   : > { %v1496_v63 = vpop.f32.mrb[3].mxu0  ;;  %v1105_v14 = vmul.f32 %v1640_v13, %v878_v62 }
 0x30a   : > { %v951_v1 = vpop.f32.mrb[6].mxu1 }
 0x30b   : > { %v1106_v3 = vmul.f32 %v1634_v0, %v951_v1  ;;  %v1024_v4 = vpop.f32.mrb[4].mxu0  ;;  %v1501_v5 = vpop.f32.mrb[7].mxu1 }
 0x30c   : > { %v1107_v6 = vmul.f32 %v1636_v2, %v1024_v4  ;;  %v1506_v7 = vpop.f32.mrb[5].mxu0 }
 0x30d   : > { %1110 = vrot.lane.b32.xlu0 %v1106_v3, %s1897_s9 }
 0x30e   : > { %1114 = vrot.lane.b32.xlu1 %v1107_v6, %s1898_s17  ;;  %v1097_v9 = vpop.f32.mrb[8].mxu1 }
 0x30f   : > { %v1108_v10 = vmul.f32 %v1638_v8, %v1097_v9  ;;  %v1511_v11 = vpop.f32.mrb[9].mxu1 }
 0x312   : > { %1118 = vrot.lane.b32.xlu1 %v1108_v10, %s1899_s29 }
 0x37f   : > { %v1111_v15 = vpop.permute.xlu0 %1110 }
 0x380   : > { %v1115_v16 = vpop.permute.xlu1 %1114  ;;  %v1121_v17 = vsel %vm454_vm1, %v1105_v14, %v1111_v15 }
 0x381   : > { %v1123_v18 = vsel %vm1122_vm3, %v1121_v17, %v1115_v16 }
 0x384   : > { %v1119_v19 = vpop.permute.xlu1 %1118 }
 0x385   : > { %v1125_v20 = vsel %vm1124_vm4, %v1123_v18, %v1119_v19 }
 0x386   : > { %1521 = vmatmul.mubr.msk.f32.vlgmr.msra.gmra.mrb[6].mxu0 %vm1131_vm5, %v1125_v20 }
 0x459   : > { %v1201_v22 = vpop.f32.mrb[6].mxu0 }
 0x45a   : > { %v1202_v23 = vadd.f32 %v1201_v22, %v1130_v21  ;;  %v1522_v24 = vpop.f32.mrb[7].mxu0 }
 0x45c   : > { %v1205_v25 = vsel %vm1131_vm5, %v1202_v23, 0.0 }
 0x45d   : > { %1206 = vadd.xlane.f32.xlu1 %v1205_v25 }
 0x4ea   : > { %v1207_v26 = vpop.xlane.xlu1 %1206 }
 0x4eb   : > { %v1209_v27 = vmul.f32 0.03125, %v1207_v26 }
 0x4ed   : > { %v1210_v28 = vsub.f32 %v1202_v23, %v1209_v27 }
 0x4ef   : > { %v1211_v29 = vmul.f32 %v1210_v28, %v1210_v28 }
 0x4f1   : > { %v1212_v30 = vsel %vm1131_vm5, %v1211_v29, 0.0 }
 0x4f2   : > { %1213 = vadd.xlane.f32.xlu0 %v1212_v30 }
 0x57f   : > { %v1214_v31 = vpop.xlane.xlu0 %1213 }
 0x580   : > { %v1215_v32 = vmul.f32 0.03125, %v1214_v31 }
 0x582   : > { %v1216_v33 = vadd.f32 1e-05, %v1215_v32 }
 0x584   : > { %1641 = vrsqrt.f32 %v1216_v33 }
 0x58e   : > { %v1642_v34 = vpop.eup %1641 }
 0x58f   : > { %v1218_v35 = vmul.f32 %v1642_v34, %v1210_v28 }
 0x591   : > { %1219 = vst.msk [vmem:[%s438_s1] sm:$0xff] %vm1131_vm5, %v1218_v35 }
 0x592   : > { %1804 = shalt.err (!%p1801_p2)
}
 0x593   : > { %s1805_s16 = scalar_lea.hbm %s2325_s13, 128  ;;  %s1809_s27 = scalar_lea.hbm %s2381_s6, 256 }
 0x594   : > { %p1806_p6 = scmp.ne.s32.totalorder %s2325_s13, %s1805_s16  ;;  %p1810_p8 = scmp.lt.u32.totalorder %s2325_s13, %s2381_s6 }
 0x595   : > { %p1811_p10 = scmp.lt.u32.totalorder %s1809_s27, %s1805_s16  ;;  %p1813_p3 = scmp.lt.u32.totalorder %s1805_s16, %s2325_s13 }
 0x596   : > { %p1807_p4 = pnand %p1806_p6, %p2426_p11 }
 0x597   : > { %p1812_p13 = por %p1811_p10, %p1810_p8 }
 0x598   : > { %p1808_p0 = pneg %p1807_p4 }
 0x599   : > { %p1814_p5 = por %p1813_p3, %p1812_p13 }
 0x59b   : > { %p1815_p9 = pnand %p1814_p5, %p1808_p0 }
 0x59d   : > { %1818 = shalt.err (!%p1815_p9)
}
 0x59e   : > { %1541 = dma.vmem_to_hbm [thread:$0]  (%p2426_p11), %s2327_s12, 128, %s2325_s13, %s1221_s10  }
 0x59f PF: > { %s2427_s11 = sld [smem:[#allocation17_spill]]  ;;  %s2428_s28 = sld [smem:[#allocation19_spill]] }
 0x5a0   : > { %p2430_p7 = scmp.ge.s32.totalorder %s1885_s26, 2 }
 0x5a5   : > { %s1247_s9 = sand.u32 1, %s2427_s11   ;;  %p2429_p12 = scmp.ne.s32.totalorder %s2428_s28, 0 }
 0x5a6   : > { %s1248_s17 = scalar_lea.sflag [#allocation4], %s1247_s9 }
 0x5a7   : > { %p1561_p1 = pnand %p2430_p7, %p2429_p12 }
 0x5a9   : > { %1860 = dma.done.wait (!%p1561_p1), %s1248_s17, 128  }
 0x5aa   : > { %1862 = vsyncadd (!%p1561_p1), %s1248_s17, 4294967168  ;;  %s28_s26 = sadd.s32 1, %s1885_s26   ;;  %s2431_s29 = sld [smem:[#allocation18_spill]] }
 0x5ab   : > { %p25_p2 = scmp.ge.s32.totalorder %s28_s26, 4   ;;  %s2432_s23 = sld [smem:[#allocation21_spill]] }
 0x5ac   : > { %s2433_s8 = sld [smem:[#allocation20_spill]]  ;;  %s2434_s21 = smov %s1869_s22 }
 0x5ad   : > { %s2436_s24 = smov %s1881_s25  ;;  %27 = sbr.rel (!%p25_p2) target bundleno = 13 (0xd), region = 133 }
 0x5b0   : > { %s2435_s22 = smov %s2431_s29 }
 0x5b2   : > { %s2437_s25 = smov %s2433_s8 }
 0x5b4   :  { %1253 = vsyncpa [#allocation3], 1 }
 0x5b5   :  { %1255 = vsyncpa [#allocation3 + $0x1], 1 }
 0x5b6   :  { %1256 = vsyncpa [#allocation6], 1 }
 0x5b7   :  { %1258 = vsyncpa [#allocation6 + $0x1], 1 }
 0x5b8   :  { %1259 = vsyncpa [#allocation9], 1 }
 0x5b9   :  { %1261 = vsyncpa [#allocation9 + $0x1], 1 }
 0x5ba   :  { %1262 = vsyncpa [#allocation4], 1 }
 0x5bb   :  { %1264 = vsyncpa [#allocation4 + $0x1], 1 }

</bundles_post_ra>
